<compile_context>
chip_gen: v7x
topology: tpu7x:2x2x1
jax: 0.10.0
libtpu: 0.0.40
codegen_flags: <defaults>
</compile_context>

<pallas_src>
import functools

import jax
import jax.numpy as jnp
from jax.experimental import pallas as pl
from jax.experimental.pallas import tpu as pltpu


def _feature_mapping_kernel(v_ref, b2_ref, bias_ref, o_ref):
    # v_ref:    (TB, i_dim)   VMEM, streamed per grid step
    # b2_ref:   (i_dim, o_dim) VMEM, resident (constant index map) == 2*pi*[B|B]
    # bias_ref: (1, o_dim)    VMEM, resident == [0.., pi/2..]
    # o_ref:    (TB, o_dim)   VMEM
    proj = jnp.dot(v_ref[...], b2_ref[...], preferred_element_type=jnp.float32)
    proj = proj + bias_ref[...]            # sublane broadcast over TB rows
    # sin(x)           for the first half (bias 0)
    # sin(x + pi/2) == cos(x) for the second half
    o_ref[...] = jnp.sin(proj).astype(o_ref.dtype)


def _round_down(x: int, m: int) -> int:
    return (x // m) * m


def _choose_batch_tile(batch, i_dim, o_dim, in_isz, out_isz, b2_isz):
    """Pick an aligned batch tile from output width + VMEM budget."""
    # Sublane alignment: 8 for 32-bit, 16 for 16-bit, 32 for 8-bit dtypes.
    align = max(8, 32 // max(1, min(in_isz, out_isz)))
    if batch <= align:
        return batch, align  # full-extent block, single grid step

    # Streaming bytes per batch row, double-buffered (input tile + output tile).
    row_bytes = 2 * (i_dim * in_isz + o_dim * out_isz)
    # Resident B2 + bias (assume worst case: compiler double-buffers them too).
    fixed = 2 * (i_dim * o_dim * b2_isz + o_dim * 4)
    budget = 12 << 20  # fits v5e's 16 MiB default scoped VMEM with headroom

    # ~2 MiB of output per grid step so the ~0.35 us per-step overhead is noise.
    tb_target = max(align, (2 << 20) // max(1, o_dim * out_isz))
    tb_vmem = max(align, max(budget - fixed, row_bytes) // row_bytes)

    # Guarantee >= min(4, possible) tiles: lets v7x shard across both TCs and
    # gives the DMA pipeline steps to overlap on every generation.
    n_aligned = batch // align
    want_tiles = min(4, n_aligned) if n_aligned >= 2 else 1
    tb_split = max(align, align * (batch // (align * want_tiles)))

    tb = min(tb_target, tb_vmem, tb_split, _round_down(batch, align))
    tb = max(align, _round_down(tb, align))
    return tb, align


@functools.partial(jax.jit, static_argnames=("out_dtype",))
def feature_mapping(v: jax.Array, b_mat: jax.Array, *, out_dtype=None) -> jax.Array:
    """phi(v): (B, i_dim) -> (B, o_dim) with o_dim = 2 * b_mat.shape[1].

    out_dtype=jnp.bfloat16 is recommended on v6e/v7x (halves HBM writeback on
    this memory-bound kernel); math stays f32 in-kernel.
    """
    batch, i_dim = v.shape
    i_dim_b, half = b_mat.shape
    assert i_dim == i_dim_b, (i_dim, i_dim_b)
    o_dim = 2 * half
    out_dtype = v.dtype if out_dtype is None else out_dtype

    # Fold 2*pi into the projection and express cos via a +pi/2 bias so the
    # kernel emits a single lane-dense sin() and one full-width store.
    b2 = (2.0 * jnp.pi * jnp.concatenate([b_mat, b_mat], axis=1)).astype(b_mat.dtype)
    bias = jnp.concatenate(
        [jnp.zeros((half,), jnp.float32), jnp.full((half,), 0.5 * jnp.pi, jnp.float32)]
    ).reshape(1, o_dim)

    in_isz = jnp.dtype(v.dtype).itemsize
    out_isz = jnp.dtype(out_dtype).itemsize
    b2_isz = jnp.dtype(b2.dtype).itemsize

    tb, _ = _choose_batch_tile(batch, i_dim, o_dim, in_isz, out_isz, b2_isz)
    grid = (pl.cdiv(batch, tb),)

    cost = pl.CostEstimate(
        flops=2 * batch * i_dim * o_dim,
        transcendentals=batch * o_dim,
        bytes_accessed=(
            batch * i_dim * in_isz
            + i_dim * o_dim * b2_isz
            + o_dim * 4
            + batch * o_dim * out_isz
        ),
    )

    # Estimated VMEM working set; raise the scoped limit only when the minimal
    # tile can't fit the default budgets (kept well under v7x's 64 MiB physical).
    est_vmem = 2 * (i_dim * o_dim * b2_isz + o_dim * 4) + 2 * tb * (
        i_dim * in_isz + o_dim * out_isz
    )
    cp_kwargs = dict(dimension_semantics=("parallel",))
    if est_vmem > (12 << 20):
        cp_kwargs["vmem_limit_bytes"] = min(int(est_vmem * 1.25) + (2 << 20), 48 << 20)

    return pl.pallas_call(
        _feature_mapping_kernel,
        out_shape=jax.ShapeDtypeStruct((batch, o_dim), out_dtype),
        grid_spec=pltpu.PrefetchScalarGridSpec(
            num_scalar_prefetch=0,
            grid=grid,
            in_specs=[
                pl.BlockSpec((tb, i_dim), lambda i: (i, 0)),
                # Constant index maps -> resident in VMEM across grid steps.
                pl.BlockSpec((i_dim, o_dim), lambda i: (0, 0)),
                pl.BlockSpec((1, o_dim), lambda i: (0, 0)),
            ],
            out_specs=pl.BlockSpec((tb, o_dim), lambda i: (i, 0)),
        ),
        compiler_params=pltpu.CompilerParams(**cp_kwargs),
        cost_estimate=cost,
    )(v, b2, bias)


def feature_mapping_ref(v: jax.Array, b_mat: jax.Array) -> jax.Array:
    proj = 2.0 * jnp.pi * (v.astype(jnp.float32) @ b_mat.astype(jnp.float32))
    return jnp.concatenate([jnp.sin(proj), jnp.cos(proj)], axis=-1)


if __name__ == "__main__":
    key = jax.random.PRNGKey(0)
    k_v, k_b, k_v2 = jax.random.split(key, 3)

    # Small demo shapes consistent with the (B, IFeatures) -> (B, OFeatures)
    # contract.
    batch = 8
    i_dim = 32
    o_dim = 64  # must be even; phi outputs sin/cos halves
    half = o_dim // 2

    v = jax.random.normal(k_v, (batch, i_dim), dtype=jnp.float32)
    b_mat = jax.random.normal(k_b, (i_dim, half), dtype=jnp.float32)

    out = jax.block_until_ready(feature_mapping(v, b_mat))
    ref = feature_mapping_ref(v, b_mat)
    assert out.shape == (batch, o_dim)
    # Tolerance accounts for cos(x) == sin(x + pi/2) and f32 range reduction
    # at |2*pi*(v@B)| up to O(100).
    assert jnp.allclose(out, ref, atol=2e-4, rtol=2e-4)

    # Exercise the tiled / pipelined path (multi-step grid, ragged last tile).
    batch2 = 1056
    v2 = jax.random.normal(k_v2, (batch2, i_dim), dtype=jnp.float32)
    out2 = jax.block_until_ready(feature_mapping(v2, b_mat))
    ref2 = feature_mapping_ref(v2, b_mat)
    assert out2.shape == (batch2, o_dim)
    assert jnp.allclose(out2, ref2, atol=2e-4, rtol=2e-4)

    print("KERNEL_OK")
</pallas_src>

<mosaic_0001>
module attributes {stable_mosaic.version = 11 : i64} {
  func.func @_feature_mapping_kernel(%arg0: i32, %arg1: memref<8x32xf32, #tpu.memory_space<vmem>>, %arg2: memref<32x64xf32, #tpu.memory_space<vmem>>, %arg3: memref<1x64xf32, #tpu.memory_space<vmem>>, %arg4: memref<8x64xf32, #tpu.memory_space<vmem>>) attributes {dimension_semantics = [#tpu.dimension_semantics<parallel>], iteration_bounds = array<i64: 1>, scalar_prefetch = 0 : i64, scratch_operands = 0 : i64, tpu.core_type = #tpu.core_type<tc>, window_params = [{transform_indices = @transform_0, window_bounds = array<i64: 8, 32>}, {pipeline_mode = #tpu.pipeline_mode<synchronous>, transform_indices = @transform_1, window_bounds = array<i64: 32, 64>}, {pipeline_mode = #tpu.pipeline_mode<synchronous>, transform_indices = @transform_2, window_bounds = array<i64: 1, 64>}, {transform_indices = @transform_3, window_bounds = array<i64: 8, 64>}]} {
    %c0 = arith.constant 0 : index
    %c0_0 = arith.constant 0 : index
    %0 = vector.load %arg1[%c0, %c0_0] : memref<8x32xf32, #tpu.memory_space<vmem>>, vector<8x32xf32>
    %c0_1 = arith.constant 0 : index
    %c0_2 = arith.constant 0 : index
    %1 = vector.load %arg2[%c0_1, %c0_2] : memref<32x64xf32, #tpu.memory_space<vmem>>, vector<32x64xf32>
    %cst = arith.constant dense<0.000000e+00> : vector<8x64xf32>
    %2 = tpu.matmul %0, %1, %cst {dimension_numbers = #tpu.dot_dimension_numbers<[1], [0], [0], [1], [0, 0, 1, 1], [], []>} : vector<8x32xf32>, vector<32x64xf32>, vector<8x64xf32> -> vector<8x64xf32>
    %c0_3 = arith.constant 0 : index
    %c0_4 = arith.constant 0 : index
    %3 = vector.load %arg3[%c0_3, %c0_4] : memref<1x64xf32, #tpu.memory_space<vmem>>, vector<1x64xf32>
    %4 = vector.broadcast %3 : vector<1x64xf32> to vector<8x64xf32>
    %5 = arith.addf %2, %4 : vector<8x64xf32>
    %6 = math.sin %5 : vector<8x64xf32>
    %c0_5 = arith.constant 0 : index
    %c0_6 = arith.constant 0 : index
    %7 = vector.load %arg4[%c0_5, %c0_6] : memref<8x64xf32, #tpu.memory_space<vmem>>, vector<8x64xf32>
    tpu.vector_store %arg4[%c0_5, %c0_6], %6 {strides = array<i32>} : memref<8x64xf32, #tpu.memory_space<vmem>>, vector<8x64xf32>,
    return
  }
  func.func @transform_0(%arg0: i32) -> (i32, i32) {
    %c0_i32 = arith.constant 0 : i32
    %c0_i32_0 = arith.constant 0 : i32
    return %arg0, %c0_i32 : i32, i32
  }
  func.func @transform_1(%arg0: i32) -> (i32, i32) {
    %c0_i32 = arith.constant 0 : i32
    %c0_i32_0 = arith.constant 0 : i32
    %c0_i32_1 = arith.constant 0 : i32
    return %c0_i32, %c0_i32_0 : i32, i32
  }
  func.func @transform_2(%arg0: i32) -> (i32, i32) {
    %c0_i32 = arith.constant 0 : i32
    %c0_i32_0 = arith.constant 0 : i32
    %c0_i32_1 = arith.constant 0 : i32
    return %c0_i32, %c0_i32_0 : i32, i32
  }
  func.func @transform_3(%arg0: i32) -> (i32, i32) {
    %c0_i32 = arith.constant 0 : i32
    %c0_i32_0 = arith.constant 0 : i32
    return %arg0, %c0_i32 : i32, i32
  }
}

</mosaic_0001>

<bundles_post_ra>
// kernel: feature_mapping.1
= control target key start
LH: loop header
LB: loop body
LE: loop exit
PB: predicated region body
PF: predicated region fallthrough
CT: control target
= control target key end

     0   :  { %v291_v3 = vmov 0.0|0.0   ;;  %vm292_vm0 = vmmov 0   ;;  %v293_v6 = vmov 0.0   ;;  %s372_s0 = inlined_call_operand.vmem [shape: f32[8,32], index: 0, kind: input, shape index: {}]   ;;  %s373_s1 = inlined_call_operand.vmem [shape: f32[32,64], index: 1, kind: input, shape index: {}]   ;;  %s374_s2 = inlined_call_operand.vmem [shape: f32[1,64], index: 2, kind: input, shape index: {}]   ;;  %s375_s3 = inlined_call_operand.hbm [shape: f32[8,64], index: 3, kind: output, shape index: {}]  }
   0x1   :  { %v16_v0 = vld [vmem:[%s373_s1] sm:$0xff]  ;;  %v17_v1 = vld [vmem:[%s373_s1 + $0x8] sm:$0xff]  ;;  %v18_v2 = vld [vmem:[%s373_s1 + $0x10] sm:$0xff]  ;;  %243 = vmatprep.subr.bf16.mxu0 %v291_v3  ;;  %240 = vmatprep.mubr.msk.f32.mxu0 %vm292_vm0, %v293_v6 }
   0x2   :  { %v244_v4 = vpack.c.bf16 %v17_v1, %v16_v0  ;;  %v19_v5 = vld [vmem:[%s373_s1 + $0x18] sm:$0xff] }
   0x3   :  { %8 = vsyncpa [#allocation3], 0  ;;  %v247_v7 = vpack.c.bf16 %v19_v5, %v18_v2  ;;  %v15_v8 = vld [vmem:[%s372_s0] sm:$0xff]  ;;  %vm27_vm1 = vcmask 261120   ;;  %v294_v23 = vmov 683565275  }
   0x4   :  { %245 = vmatpush3.bf16.msra.mxu0 %v244_v4  ;;  %v221_v9 = vld [vmem:[%s374_s2] ss:$0 sm:$0xff]  ;;  %v295_v25 = vmov 2475754826   ;;  %v296_v28 = vmov 2131351028  }
   0x5   :  { %246 = vmatprep.subr.bf16.mxu0 %v291_v3  ;;  %v297_v31 = vmov 2102212464   ;;  %v298_v34 = vmov 920167782   ;;  %v299_v37 = vmov 1326507024  }
   0x6   :  { %s300_s0 = smov [#allocation2]   ;;  %vm205_vm14 = vcmask 523264  }
   0x7   :  { %s213_s1 = sshll.u32 %s300_s0, 4  ;;  %s214_s1 = int_to_ptr.vmem [resolvable:$true] %s213_s1 }
   0x8   :  { %248 = vmatpush3.bf16.msra.mxu0 %v247_v7  ;;  %s267_s2 = scalar_lea.vmem %s214_s1, 128  ;;  %p272_p1 = scmp.lt.s32.totalorder %s214_s1, %s214_s1 }
   0x9   :  { %p268_p0 = scmp.ne.s32.totalorder %s214_s1, %s267_s2  ;;  %p273_p2 = scmp.lt.s32.totalorder %s267_s2, %s267_s2 }
   0xb   :  { %241 = vmatmul.mubr.msk.f32.vlgmr.msra.gmra.mrb[0].mxu0 %vm27_vm1, %v15_v8  ;;  %p274_p3 = por %p273_p2, %p272_p1 }
   0xd   :  { %p275_p4 = pnand %p274_p3, %p268_p0 }
  0xde   :  { %v97_v10 = vpop.f32.mrb[0].mxu0 }
  0xdf   :  { %v339_v11 = vadd.f32 %v221_v9, %v97_v10  ;;  %v242_v12 = vpop.f32.mrb[1].mxu0 }
  0xe1   :  { %v104_v13 = vand.u32 2139095040, %v339_v11  ;;  %v101_v17 = vand.u32 2147483647, %v339_v11  ;;  %vm103_vm9 = vcmp.lt.s32.totalorder %v339_v11, 0  ;;  %vm193_vm15 = vweird.f32 %v339_v11 }
  0xe3   :  { %v105_v14 = vshrl.u32 %v104_v13, 23  ;;  %v108_v20 = vand.u32 8388607, %v101_v17  ;;  %vm102_vm10 = vcmp.le.f32.partialorder %v101_v17, 0.7853982 }
  0xe5   :  { %v223_v15 = vadd.s32 4294967169, %v105_v14  ;;  %v109_v39 = vor.u32 8388608, %v108_v20 }
  0xe7   :  { %v111_v16 = vadd.s32 1, %v223_v15  ;;  %v149_v53 = vshll.u32 %v109_v39, 8 }
  0xe9   :  { %vm112_vm2 = vcmp.gt.s32.totalorder %v111_v16, 0 }
  0xea   :  { %v113_v18 = vsel %vm112_vm2, %v111_v16, 0 }
  0xeb   :  { %v115_v19 = vand.u32 31, %v113_v18  ;;  %v114_v22 = vshrl.u32 %v113_v18, 5 }
  0xed   :  { %v116_v21 = vsub.s32 32, %v115_v19  ;;  %v118_v24 = vshll.u32 %v294_v23, %v115_v19  ;;  %v121_v26 = vshll.u32 %v295_v25, %v115_v19  ;;  %v124_v30 = vshll.u32 %v296_v28, %v115_v19 }
  0xee   :  { %v127_v33 = vshll.u32 %v297_v31, %v115_v19  ;;  %v130_v36 = vshll.u32 %v298_v34, %v115_v19  ;;  %vm133_vm3 = vcmp.lt.s32.totalorder %v114_v22, 1  ;;  %vm136_vm4 = vcmp.lt.s32.totalorder %v114_v22, 4 }
  0xef   :  { %v119_v27 = vshrl.u32 %v295_v25, %v116_v21  ;;  %v122_v29 = vshrl.u32 %v296_v28, %v116_v21  ;;  %v125_v32 = vshrl.u32 %v297_v31, %v116_v21  ;;  %v128_v35 = vshrl.u32 %v298_v34, %v116_v21 }
  0xf0   :  { %v131_v38 = vshrl.u32 %v299_v37, %v116_v21  ;;  %v117_v48 = vshrl.u32 %v294_v23, %v116_v21  ;;  %vm135_vm5 = vcmp.lt.s32.totalorder %v114_v22, 3  ;;  %vm134_vm6 = vcmp.lt.s32.totalorder %v114_v22, 2 }
  0xf1   :  { %v120_v40 = vor.u32 %v119_v27, %v118_v24  ;;  %v123_v41 = vor.u32 %v122_v29, %v121_v26  ;;  %v126_v42 = vor.u32 %v125_v32, %v124_v30  ;;  %v129_v43 = vor.u32 %v128_v35, %v127_v33 }
  0xf2   :  { %v132_v44 = vor.u32 %v131_v38, %v130_v36 }
  0xf3   :  { %v138_v45 = vsel %vm136_vm4, %v126_v42, 2102212464  ;;  %v141_v46 = vsel %vm133_vm3, %v120_v40, %v123_v41  ;;  %v145_v47 = vsel %vm133_vm3, %v123_v41, %v126_v42  ;;  %v142_v49 = vsel %vm136_vm4, %v129_v43, 920167782 }
  0xf4   :  { %v146_v50 = vsel %vm136_vm4, %v132_v44, 1326507024  ;;  %v143_v51 = vsel %vm135_vm5, %v126_v42, %v142_v49  ;;  %v137_v54 = vsel %vm133_vm3, %v117_v48, %v120_v40  ;;  %v139_v55 = vsel %vm135_vm5, %v123_v41, %v138_v45 }
  0xf5   :  { %v147_v52 = vsel %vm135_vm5, %v129_v43, %v146_v50  ;;  %v144_v56 = vsel %vm134_vm6, %v141_v46, %v143_v51  ;;  %v140_v62 = vsel %vm134_vm6, %v137_v54, %v139_v55 }
  0xf6   :  { %v148_v57 = vsel %vm134_vm6, %v145_v47, %v147_v52  ;;  %v348_v60 = vmul.u32.u64.low %v149_v53, %v144_v56  ;;  %v349_v61 = vmul.u32.u64.high %v149_v53, %v144_v56, %v348_v60  ;;  %v156_v0 = vmul.u32 %v149_v53, %v140_v62 }
  0xf7   :  { %v345_v58 = vmul.u32.u64.low %v149_v53, %v148_v57  ;;  %v346_v59 = vmul.u32.u64.high %v149_v53, %v148_v57, %v345_v58 }
  0xf8   :  { %v159_v63 = vadd.s32 1, %v349_v61 }
  0xf9   :  { %vm158_vm7 = vc.u32 %v346_v59, %v348_v60  ;;  %v157_v13 = vadd.s32 %v348_v60, %v346_v59 }
  0xfa   :  { %v160_v1 = vsel %vm158_vm7, %v159_v63, %v349_v61 }
  0xfb   :  { %v161_v2 = vadd.s32 %v160_v1, %v156_v0 }
  0xfd   :  { %v162_v3 = vadd.s32 536870912, %v161_v2 }
  0xff   :  { %v163_v4 = vshrl.u32 %v162_v3, 30 }
 0x101   :  { %v164_v5 = vshll.u32 %v163_v4, 30  ;;  %v187_v26 = vsub.s32 4, %v163_v4 }
 0x103   :  { %v165_v6 = vsub.s32 %v161_v2, %v164_v5  ;;  %v188_v29 = vsel %vm103_vm9, %v187_v26, %v163_v4 }
 0x104   :  { %v190_v31 = vsel %vm102_vm10, 0, %v188_v29 }
 0x105   :  { %v167_v7 = vsub.s32 0, %v165_v6  ;;  %v194_v32 = vadd.s32 3, %v190_v31 }
 0x107   :  { %v224_v8 = vmin.u32 %v167_v7, %v165_v6  ;;  %v195_v33 = vand.u32 3, %v194_v32 }
 0x109   :  { %v169_v9 = vclz %v224_v8  ;;  %vm200_vm11 = vcmp.eq.s32.totalorder %v195_v33, 2  ;;  %vm197_vm12 = vcmp.eq.s32.totalorder %v195_v33, 0  ;;  %vm196_vm13 = vcmp.lt.s32.totalorder %v195_v33, 2 }
 0x10b   :  { %v225_v10 = vadd.s32 4294967294, %v169_v9 }
 0x10d   :  { %vm226_vm8 = vcmp.lt.s32.totalorder %v225_v10, 0 }
 0x10e   :  { %v172_v12 = vsel %vm226_vm8, 0, %v225_v10 }
 0x10f   :  { %v173_v14 = vsub.s32 32, %v172_v12  ;;  %v177_v15 = vsub.s32 4294967266, %v172_v12  ;;  %v174_v16 = vshll.u32 %v165_v6, %v172_v12 }
 0x111   :  { %v175_v18 = vshrl.u32 %v157_v13, %v173_v14  ;;  %v178_v19 = vadd.s32 127, %v177_v15 }
 0x113   :  { %v176_v20 = vor.u32 %v175_v18, %v174_v16  ;;  %v179_v21 = vshll.u32 %v178_v19, 23 }
 0x115   :  { %v180_v22 = vor.u32 4788187, %v179_v21  ;;  %v183_v24 = vcvt.s32.f32 %v176_v20 }
 0x117   :  { %v181_v23 = vand.u32 2147483647, %v180_v22 }
 0x119   :  { %v184_v25 = vmul.f32 %v183_v24, %v181_v23 }
 0x11b   :  { %v185_v27 = vxor.u32 2147483648, %v184_v25 }
 0x11d   :  { %v186_v28 = vsel %vm103_vm9, %v185_v27, %v184_v25 }
 0x11e   :  { %v189_v30 = vsel %vm102_vm10, %v339_v11, %v186_v28 }
 0x11f   :  { %263 = vcosq.f32 %v189_v30 }
 0x120   :  { %265 = vsinq.f32 %v189_v30 }
 0x129   :  { %v264_v34 = vpop.eup %263 }
 0x12a   :  { %v266_v35 = vpop.eup %265  ;;  %v201_v36 = vxor.u32 2147483648, %v264_v34 }
 0x12b   :  { %v198_v37 = vxor.u32 2147483648, %v266_v35 }
 0x12c   :  { %v202_v38 = vsel %vm200_vm11, %v201_v36, %v266_v35 }
 0x12d   :  { %v199_v39 = vsel %vm197_vm12, %v264_v34, %v198_v37 }
 0x12e   :  { %v203_v17 = vsel %vm196_vm13, %v199_v39, %v202_v38 }
 0x12f   :  { %v204_v40 = vsel %vm193_vm15, nan, %v203_v17 }
 0x130   :  { %206 = vst.msk [vmem:[#allocation2] sm:$0xff] %vm205_vm14, %v204_v40 }
 0x131   :  { %278 = shalt.err (!%p275_p4)
}
 0x132   :  { %s279_s26 = scalar_lea.hbm %s375_s3, 128 }
 0x133   :  { %p280_p5 = scmp.ne.s32.totalorder %s375_s3, %s279_s26  ;;  %p283_p6 = scmp.lt.u32.totalorder %s279_s26, %s375_s3 }
 0x135   :  { %p285_p7 = pnand %p283_p6, %p280_p5 }
 0x137   :  { %288 = shalt.err (!%p285_p7)
}
 0x138   :  { %216 = dma.vmem_to_hbm [thread:$0]  %s214_s1, 128, %s375_s3, [#allocation3]  }
 0x139   :  { %289 = dma.done.wait [#allocation3], 128  }
 0x13a   :  { %290 = vsyncadd [#allocation3], 4294967168 }
 0x13b   :  { %220 = vsyncpa [#allocation3], 1 }

</bundles_post_ra>
